<compile_context>
chip_gen: v5e
topology: v5e:2x2
jax: 0.10.0
libtpu: 0.0.40
codegen_flags: <defaults>
</compile_context>

<pallas_src>
import numpy as np
import jax
import jax.numpy as jnp
from jax.experimental import pallas as pl
from jax.experimental.pallas import tpu as pltpu


def summary_attn_kernel(q_ref, v_ref, w0_ref, b0_ref, w1_ref, b1_ref, out_ref):
    bb, S, D = q_ref.shape
    H = w1_ref.shape[-1]

    w0 = w0_ref[...]                                   # (D, D)  MXU dtype
    w1 = w1_ref[...]                                   # (D, H)  MXU dtype
    b0 = b0_ref[...]                                   # (1, D)  f32
    b1 = b1_ref[...]                                   # (1, H)  f32

    # Flatten the batch block into the MXU M dim: one (bb*S, D) x (D, D) matmul.
    qf = q_ref[...].reshape(bb * S, D)
    h = jnp.dot(qf, w0, preferred_element_type=jnp.float32)             # (bb*S, D) f32
    h = jnp.maximum(h + b0, 0.0)

    scores = jnp.dot(h.astype(w1.dtype), w1,
                     preferred_element_type=jnp.float32) + b1           # (bb*S, H) f32
    scores = scores.reshape(bb, S, H)

    # softmax over the sequence axis: equivalent to PyTorch softmax(dim=-1) applied
    # after the (-2, -1) transpose, without materializing the transpose.
    m = jnp.max(scores, axis=1, keepdims=True)                          # (bb, 1, H)
    e = jnp.exp(scores - m)
    p = e / jnp.sum(e, axis=1, keepdims=True)                           # (bb, S, H)

    # Fold the mean over the H heads into the attention weights:
    #   mean_h(p_attn @ value) == (mean_h p_attn) @ value
    w_mean = jnp.mean(p, axis=-1)                                       # (bb, S)

    v = v_ref[...].astype(jnp.float32)                                  # (bb, S, D)
    out = jnp.sum(w_mean[..., None] * v, axis=1)                        # (bb, D)
    out_ref[...] = out.astype(out_ref.dtype)


def _choose_block_b(B, S, D, qv_bytes_per_elem, *, target_steps=16,
                    tile_budget_bytes=4 << 20):
    """Pick block_b so each q+v tile stays around tile_budget_bytes (the pipeline
    double-buffers them) and the grid has >= target_steps steps when B allows
    (per-step overhead is only ~0.35us, and v7x splits a parallel grid over 2 TCs)."""
    per_item = max(1, S * D * qv_bytes_per_elem)        # q + v bytes per batch item
    bb_vmem = max(1, tile_budget_bytes // per_item)
    bb_steps = max(1, B // target_steps)
    bb = int(max(1, min(B, bb_vmem, bb_steps)))
    while B % bb:
        bb -= 1
    return bb


def _vmem_limit_bytes(block_b, S, D, H, q_itemsize, v_itemsize, w_itemsize):
    """Explicit working-set budget; clamp to [32 MiB, 40 MiB] so it is a no-op or a
    safe raise on v5e/v6e (128 MiB physical) and still fits v7x (64 MiB physical)."""
    weights = (D * D + D * H) * w_itemsize + (D + H) * 4
    tiles = 2 * block_b * S * D * (q_itemsize + v_itemsize)   # double-buffered q + v
    outs = 2 * block_b * D * 4
    interm = block_b * S * (2 * D + 4 * H) * 4                # h / scores / exp live ranges
    est = weights + tiles + outs + interm
    return int(min(max(2 * est, 32 << 20), 40 << 20))


def summary_attn(query, value, params, *, block_b=None, mxu_dtype=jnp.bfloat16):
    """SummaryAttn forward (is_cat=False): returns (B, D)."""
    B, S, D = query.shape
    assert value.shape == (B, S, D)
    H = params["w1"].shape[-1]

    # Cast MXU operands once in the wrapper (halves weight/q HBM + VMEM traffic).
    w0 = params["w0"].astype(mxu_dtype)
    w1 = params["w1"].astype(mxu_dtype)
    b0 = params["b0"].astype(jnp.float32)
    b1 = params["b1"].astype(jnp.float32)
    q = query.astype(mxu_dtype)
    v = value

    q_itemsize = jnp.dtype(mxu_dtype).itemsize
    v_itemsize = jnp.dtype(v.dtype).itemsize

    if block_b is None:
        block_b = _choose_block_b(B, S, D, q_itemsize + v_itemsize)
    block_b = min(block_b, B)
    while B % block_b:
        block_b -= 1
    n_blocks = B // block_b

    vmem_limit = _vmem_limit_bytes(block_b, S, D, H, q_itemsize, v_itemsize, q_itemsize)

    def const_spec(arr):
        return pl.BlockSpec(arr.shape, lambda i: (0, 0))   # fetched once (constant index)

    in_specs = [
        pl.BlockSpec((block_b, S, D), lambda i: (i, 0, 0)),   # query tile
        pl.BlockSpec((block_b, S, D), lambda i: (i, 0, 0)),   # value tile
        const_spec(w0),
        const_spec(b0),
        const_spec(w1),
        const_spec(b1),
    ]
    # Leading axis squeezed so the block's last two dims equal full array dims
    # (satisfies the (8,128)/full-dim BlockSpec rule for any block_b).
    out_specs = pl.BlockSpec((None, block_b, D), lambda i: (i, 0, 0))
    out_shape = jax.ShapeDtypeStruct((n_blocks, block_b, D), query.dtype)

    out = pl.pallas_call(
        summary_attn_kernel,
        grid=(n_blocks,),
        in_specs=in_specs,
        out_specs=out_specs,
        out_shape=out_shape,
        compiler_params=pltpu.CompilerParams(
            dimension_semantics=("parallel",),
            vmem_limit_bytes=vmem_limit,
        ),
    )(q, v, w0, b0, w1, b1)

    return out.reshape(B, D)


def init_params(key, dim, num_attn):
    """Deterministic synthetic init (shapes follow the PyTorch module).
    Weights are stored pre-transposed as (in_dim, out_dim) so the kernel does x @ W."""
    r = float(np.sqrt(6.0) / np.sqrt(dim + dim))
    k0, k1, k2, k3 = jax.random.split(key, 4)

    def u(k, shape, scale):
        return jax.random.uniform(k, shape, jnp.float32, -scale, scale)

    return {
        "w0": u(k0, (dim, dim), r),        # nn.Linear(dim, dim).weight^T
        "b0": u(k1, (1, dim), 0.1),        # nn.Linear(dim, dim).bias
        "w1": u(k2, (dim, num_attn), r),   # nn.Linear(dim, num_attn).weight^T
        "b1": u(k3, (1, num_attn), 0.1),   # nn.Linear(dim, num_attn).bias
    }


def reference_forward(query, value, params):
    """Pure-numpy (float64) reference mirroring the PyTorch forward (is_cat=False)."""
    q = np.asarray(query, np.float64)
    v = np.asarray(value, np.float64)
    w0 = np.asarray(params["w0"], np.float64)
    b0 = np.asarray(params["b0"], np.float64)
    w1 = np.asarray(params["w1"], np.float64)
    b1 = np.asarray(params["b1"], np.float64)

    h = np.maximum(q @ w0 + b0, 0.0)                   # (B, S, D)
    scores = np.swapaxes(h @ w1 + b1, -1, -2)          # (B, H, S)
    m = scores.max(-1, keepdims=True)
    e = np.exp(scores - m)
    p = e / e.sum(-1, keepdims=True)                   # softmax over S
    weighted = p @ v                                    # (B, H, D)
    return weighted.mean(-2)                            # (B, D)


if __name__ == "__main__":
    # Hardware-shaped but small: S multiple of 8, D multiple of 128 (lane-dense output).
    B, S, D, H = 4, 8, 128, 4

    key = jax.random.PRNGKey(0)
    kq, kv, kp = jax.random.split(key, 3)
    query = jax.random.normal(kq, (B, S, D), jnp.float32)
    value = jax.random.normal(kv, (B, S, D), jnp.float32)
    params = init_params(kp, D, H)

    # 1) Math check: f32 MXU operands vs float64 reference (tight tolerance).
    out_f32 = summary_attn(query, value, params, mxu_dtype=jnp.float32)
    jax.block_until_ready(out_f32)
    ref = reference_forward(query, value, params)
    np.testing.assert_allclose(np.asarray(out_f32, np.float64), ref, rtol=2e-3, atol=2e-3)

    # 2) Fast path: default bf16 MXU operands, compared against a reference fed the same
    #    bf16-rounded q / weights so only accumulation-precision noise remains.
    out_bf16 = summary_attn(query, value, params)
    jax.block_until_ready(out_bf16)
    q_r = query.astype(jnp.bfloat16).astype(jnp.float32)
    params_r = dict(
        params,
        w0=params["w0"].astype(jnp.bfloat16).astype(jnp.float32),
        w1=params["w1"].astype(jnp.bfloat16).astype(jnp.float32),
    )
    ref_bf16 = reference_forward(q_r, value, params_r)
    np.testing.assert_allclose(np.asarray(out_bf16, np.float64), ref_bf16, rtol=2e-2, atol=1e-2)

    print("KERNEL_OK")
</pallas_src>

<mosaic_0001>
module attributes {stable_mosaic.version = 11 : i64} {
  func.func @summary_attn_kernel(%arg0: i32, %arg1: memref<1x8x128xf32, #tpu.memory_space<vmem>>, %arg2: memref<1x8x128xf32, #tpu.memory_space<vmem>>, %arg3: memref<128x128xf32, #tpu.memory_space<vmem>>, %arg4: memref<1x128xf32, #tpu.memory_space<vmem>>, %arg5: memref<128x4xf32, #tpu.memory_space<vmem>>, %arg6: memref<1x4xf32, #tpu.memory_space<vmem>>, %arg7: memref<1x1x128xf32, #tpu.memory_space<vmem>>) attributes {dimension_semantics = [#tpu.dimension_semantics<parallel>], iteration_bounds = array<i64: 4>, scalar_prefetch = 0 : i64, scratch_operands = 0 : i64, tpu.core_type = #tpu.core_type<tc>, window_params = [{transform_indices = @transform_0, window_bounds = array<i64: 1, 8, 128>}, {transform_indices = @transform_1, window_bounds = array<i64: 1, 8, 128>}, {pipeline_mode = #tpu.pipeline_mode<synchronous>, transform_indices = @transform_2, window_bounds = array<i64: 128, 128>}, {pipeline_mode = #tpu.pipeline_mode<synchronous>, transform_indices = @transform_3, window_bounds = array<i64: 1, 128>}, {pipeline_mode = #tpu.pipeline_mode<synchronous>, transform_indices = @transform_4, window_bounds = array<i64: 128, 4>}, {pipeline_mode = #tpu.pipeline_mode<synchronous>, transform_indices = @transform_5, window_bounds = array<i64: 1, 4>}, {transform_indices = @transform_6, window_bounds = array<i64: 1, 1, 128>}]} {
    %c0 = arith.constant 0 : index
    %c0_0 = arith.constant 0 : index
    %0 = vector.load %arg3[%c0, %c0_0] : memref<128x128xf32, #tpu.memory_space<vmem>>, vector<128x128xf32>
    %c0_1 = arith.constant 0 : index
    %c0_2 = arith.constant 0 : index
    %1 = vector.load %arg5[%c0_1, %c0_2] : memref<128x4xf32, #tpu.memory_space<vmem>>, vector<128x4xf32>
    %c0_3 = arith.constant 0 : index
    %c0_4 = arith.constant 0 : index
    %2 = vector.load %arg4[%c0_3, %c0_4] : memref<1x128xf32, #tpu.memory_space<vmem>>, vector<1x128xf32>
    %c0_5 = arith.constant 0 : index
    %c0_6 = arith.constant 0 : index
    %3 = vector.load %arg6[%c0_5, %c0_6] : memref<1x4xf32, #tpu.memory_space<vmem>>, vector<1x4xf32>
    %c0_7 = arith.constant 0 : index
    %c0_8 = arith.constant 0 : index
    %c0_9 = arith.constant 0 : index
    %4 = vector.load %arg1[%c0_7, %c0_8, %c0_9] : memref<1x8x128xf32, #tpu.memory_space<vmem>>, vector<1x8x128xf32>
    %5 = vector.shape_cast %4 : vector<1x8x128xf32> to vector<8x128xf32>
    %cst = arith.constant dense<0.000000e+00> : vector<8x128xf32>
    %6 = tpu.matmul %5, %0, %cst {dimension_numbers = #tpu.dot_dimension_numbers<[1], [0], [0], [1], [0, 0, 1, 1], [], []>} : vector<8x128xf32>, vector<128x128xf32>, vector<8x128xf32> -> vector<8x128xf32>
    %7 = vector.broadcast %2 : vector<1x128xf32> to vector<8x128xf32>
    %8 = arith.addf %6, %7 : vector<8x128xf32>
    %cst_10 = arith.constant 0.000000e+00 : f32
    %9 = vector.broadcast %cst_10 : f32 to vector<8x128xf32>
    %10 = arith.maximumf %8, %9 : vector<8x128xf32>
    %cst_11 = arith.constant dense<0.000000e+00> : vector<8x4xf32>
    %11 = tpu.matmul %10, %1, %cst_11 {dimension_numbers = #tpu.dot_dimension_numbers<[1], [0], [0], [1], [0, 0, 1, 1], [], []>} : vector<8x128xf32>, vector<128x4xf32>, vector<8x4xf32> -> vector<8x4xf32>
    %12 = vector.broadcast %3 : vector<1x4xf32> to vector<8x4xf32>
    %13 = arith.addf %11, %12 : vector<8x4xf32>
    %14 = vector.shape_cast %13 : vector<8x4xf32> to vector<1x8x4xf32>
    %cst_12 = arith.constant dense<0xFF800000> : vector<1x4xf32>
    %15 = vector.multi_reduction <maximumf>, %14, %cst_12 [1] : vector<1x8x4xf32> to vector<1x4xf32>
    %16 = vector.shape_cast %15 : vector<1x4xf32> to vector<1x1x4xf32>
    %17 = vector.broadcast %16 : vector<1x1x4xf32> to vector<1x8x4xf32>
    %18 = arith.subf %14, %17 : vector<1x8x4xf32>
    %19 = math.exp %18 : vector<1x8x4xf32>
    %cst_13 = arith.constant dense<0.000000e+00> : vector<1x4xf32>
    %20 = vector.multi_reduction <add>, %19, %cst_13 [1] : vector<1x8x4xf32> to vector<1x4xf32>
    %21 = vector.shape_cast %20 : vector<1x4xf32> to vector<1x1x4xf32>
    %22 = vector.broadcast %21 : vector<1x1x4xf32> to vector<1x8x4xf32>
    %23 = arith.divf %19, %22 : vector<1x8x4xf32>
    %cst_14 = arith.constant dense<0.000000e+00> : vector<1x8xf32>
    %24 = vector.multi_reduction <add>, %23, %cst_14 [2] : vector<1x8x4xf32> to vector<1x8xf32>
    %cst_15 = arith.constant 4.000000e+00 : f32
    %25 = vector.broadcast %cst_15 : f32 to vector<1x8xf32>
    %26 = arith.divf %24, %25 : vector<1x8xf32>
    %c0_16 = arith.constant 0 : index
    %c0_17 = arith.constant 0 : index
    %c0_18 = arith.constant 0 : index
    %27 = vector.load %arg2[%c0_16, %c0_17, %c0_18] : memref<1x8x128xf32, #tpu.memory_space<vmem>>, vector<1x8x128xf32>
    %28 = vector.shape_cast %26 : vector<1x8xf32> to vector<1x8x1xf32>
    %29 = vector.broadcast %28 : vector<1x8x1xf32> to vector<1x8x128xf32>
    %30 = arith.mulf %29, %27 : vector<1x8x128xf32>
    %cst_19 = arith.constant dense<0.000000e+00> : vector<1x128xf32>
    %31 = vector.multi_reduction <add>, %30, %cst_19 [1] : vector<1x8x128xf32> to vector<1x128xf32>
    %c0_20 = arith.constant 0 : index
    %c0_21 = arith.constant 0 : index
    %c0_22 = arith.constant 0 : index
    %32 = vector.load %arg7[%c0_20, %c0_21, %c0_22] : memref<1x1x128xf32, #tpu.memory_space<vmem>>, vector<1x1x128xf32>
    %33 = vector.shape_cast %32 : vector<1x1x128xf32> to vector<1x128xf32>
    %34 = vector.shape_cast %31 : vector<1x128xf32> to vector<1x1x128xf32>
    tpu.vector_store %arg7[%c0_20, %c0_21, %c0_22], %34 {strides = array<i32>} : memref<1x1x128xf32, #tpu.memory_space<vmem>>, vector<1x1x128xf32>,
    return
  }
  func.func @transform_0(%arg0: i32) -> (i32, i32, i32) {
    %c0_i32 = arith.constant 0 : i32
    %c0_i32_0 = arith.constant 0 : i32
    %c0_i32_1 = arith.constant 0 : i32
    return %arg0, %c0_i32, %c0_i32_0 : i32, i32, i32
  }
  func.func @transform_1(%arg0: i32) -> (i32, i32, i32) {
    %c0_i32 = arith.constant 0 : i32
    %c0_i32_0 = arith.constant 0 : i32
    %c0_i32_1 = arith.constant 0 : i32
    return %arg0, %c0_i32, %c0_i32_0 : i32, i32, i32
  }
  func.func @transform_2(%arg0: i32) -> (i32, i32) {
    %c0_i32 = arith.constant 0 : i32
    %c0_i32_0 = arith.constant 0 : i32
    %c0_i32_1 = arith.constant 0 : i32
    return %c0_i32, %c0_i32_0 : i32, i32
  }
  func.func @transform_3(%arg0: i32) -> (i32, i32) {
    %c0_i32 = arith.constant 0 : i32
    %c0_i32_0 = arith.constant 0 : i32
    %c0_i32_1 = arith.constant 0 : i32
    return %c0_i32, %c0_i32_0 : i32, i32
  }
  func.func @transform_4(%arg0: i32) -> (i32, i32) {
    %c0_i32 = arith.constant 0 : i32
    %c0_i32_0 = arith.constant 0 : i32
    %c0_i32_1 = arith.constant 0 : i32
    return %c0_i32, %c0_i32_0 : i32, i32
  }
  func.func @transform_5(%arg0: i32) -> (i32, i32) {
    %c0_i32 = arith.constant 0 : i32
    %c0_i32_0 = arith.constant 0 : i32
    %c0_i32_1 = arith.constant 0 : i32
    return %c0_i32, %c0_i32_0 : i32, i32
  }
  func.func @transform_6(%arg0: i32) -> (i32, i32, i32) {
    %c0_i32 = arith.constant 0 : i32
    %c0_i32_0 = arith.constant 0 : i32
    %c0_i32_1 = arith.constant 0 : i32
    return %arg0, %c0_i32, %c0_i32_0 : i32, i32, i32
  }
}

</mosaic_0001>

<bundles_post_ra>
// kernel: tpu_custom_call.1
= control target key start
LH: loop header
LB: loop body
LE: loop exit
PB: predicated region body
PF: predicated region fallthrough
CT: control target
= control target key end

     0   :  { %s1054_s0 = inlined_call_operand.hbm [shape: f32[4,8,128], index: 0, kind: input, shape index: {}]   ;;  %s1055_s1 = inlined_call_operand.hbm [shape: f32[4,8,128], index: 1, kind: input, shape index: {}]   ;;  %s1056_s2 = inlined_call_operand.vmem [shape: f32[128,128], index: 2, kind: input, shape index: {}]   ;;  %s1057_s3 = inlined_call_operand.vmem [shape: f32[1,128], index: 3, kind: input, shape index: {}]   ;;  %s1058_s4 = inlined_call_operand.vmem [shape: f32[128,4], index: 4, kind: input, shape index: {}]   ;;  %s1059_s5 = inlined_call_operand.vmem [shape: f32[1,4], index: 5, kind: input, shape index: {}]   ;;  %s1060_s6 = inlined_call_operand.hbm [shape: f32[4,1,128], index: 6, kind: output, shape index: {}]  }
   0x1   :  { %1062 = sst [smem:[#allocation13_spill]] %s1054_s0 }
   0x2   :  { %11 = vsyncpa [#allocation3], 0 }
   0x3   :  { %13 = vsyncpa [#allocation3 + $0x1], 0 }
   0x4   :  { %14 = vsyncpa [#allocation6], 0 }
   0x5   :  { %16 = vsyncpa [#allocation6 + $0x1], 0 }
   0x6   :  { %17 = vsyncpa [#allocation4], 0 }
   0x7   :  { %19 = vsyncpa [#allocation4 + $0x1], 0  ;;  %s784_s21 = smov 0   ;;  %s786_s22 = smov 0  }
   0x8   :  { %s788_s23 = smov 0   ;;  %s790_s24 = smov 0  }
   0x9 LB: > { %1063 = sst [smem:[#allocation11_spill]] %s742_s23  ;;  %s805_s25 = sadd.s32 4294967295, %s746_s24   ;;  %s746_s24 = sphi %s790_s24, %s1076_s24   ;;  %s742_s23 = sphi %s788_s23, %s1073_s23   ;;  %s738_s22 = sphi %s786_s22, %s1075_s22   ;;  %s734_s21 = sphi %s784_s21, %s1074_s21  }
   0xa   : > { %s544_s26 = sadd.s32 4294967294, %s746_s24   ;;  %s809_s27 = sadd.s32 1, %s746_s24  }
   0xb   : > { %s32_s28 = sadd.s32 1, %s742_s23  ;;  %s29_s29 = ssub.s32 %s746_s24, %s809_s27 }
   0xc   : > { %p39_p0 = scmp.ne.s32.totalorder %s742_s23, %s738_s22  ;;  %p30_p1 = scmp.eq.s32.totalorder %s29_s29, 0 }
   0xd   : > { %p40_p2 = scmp.eq.s32.totalorder %s746_s24, 0  ;;  %p45_p3 = scmp.ne.s32.totalorder %s738_s22, %s734_s21 }
   0xe   : > { %p46_p4 = scmp.eq.s32.totalorder %s805_s25, 0  ;;  %p179_p7 = scmp.eq.s32.totalorder %s805_s25, 3 }
   0xf   : > { %s821_s30 = scalar_select %p30_p1, %s742_s23, %s32_s28  }
  0x10   : > { %p823_p5 = por %p40_p2, %p39_p0  ;;  %p827_p6 = por %p46_p4, %p45_p3 }
  0x11   : > { %1064 = sst [smem:[#allocation12_spill]] %s821_s30  ;;  %p185_p8 = scmp.eq.s32.totalorder %s544_s26, 3 }
  0x12   : > { %p573_p9 = scmp.lt.s32.totalorder %s746_s24, 4  ;;  %p833_p10 = por %p179_p7, %p39_p0 }
  0x13   : > { %p837_p11 = por %p185_p8, %p45_p3  ;;  %s842_s11 = sand.u32 1, %s742_s23  }
  0x14   : > { %s548_s12 = sshll.u32 %s746_s24, 3  ;;  %s547_s13 = sshll.u32 %s842_s11, 3 }
  0x15   : > { %s1069_s0 = sld [smem:[#allocation13_spill]]  ;;  %s221_s18 = scalar_lea.vmem [#allocation2], %s547_s13 }
  0x16   : > { %s229_s19 = sshll.u32 %s221_s18, 4  ;;  %p851_p12 = pnand %p573_p9, %p823_p5  ;;  %s230_s19 = int_to_ptr.vmem [resolvable:$true] %s229_s19 }
  0x17   : > { %p551_p13 = scmp.ge.s32.totalorder %s746_s24, 1  ;;  %p253_p0 = scmp.lt.s32.totalorder %s746_s24, 5 }
  0x18   : > { %s218_s26 = scalar_lea.sflag [#allocation3], %s842_s11  ;;  %p620_p2 = pneg %p851_p12 }
  0x1b   : > { %s225_s16 = scalar_lea.hbm %s1069_s0, %s548_s12  ;;  %s623_s15 = scalar_lea.hbm %s1069_s0, 32 }
  0x1c   : > { %s227_s17 = sshll.u32 %s225_s16, 4  ;;  %s228_s17 = int_to_ptr.hbm [resolvable:$true] %s227_s17 }
  0x1d   : > { %s616_s28 = sshra.s32 %s228_s17, 4  ;;  %s617_s28 = int_to_ptr.hbm [resolvable:$true] %s616_s28 }
  0x1e   : > { %s618_s29 = scalar_lea.hbm %s617_s28, 8  ;;  %p624_p5 = scmp.lt.s32.totalorder %s617_s28, %s1069_s0 }
  0x1f   : > { %p619_p1 = scmp.ne.s32.totalorder %s617_s28, %s618_s29  ;;  %p625_p7 = scmp.lt.s32.totalorder %s623_s15, %s618_s29 }
  0x21   : > { %p621_p3 = pnand %p620_p2, %p619_p1  ;;  %p626_p8 = por %p625_p7, %p624_p5 }
  0x23   : > { %p622_p4 = pneg %p621_p3 }
  0x25   : > { %p627_p9 = pnand %p626_p8, %p622_p4 }
  0x27   : > { %630 = shalt.err (!%p627_p9)
}
  0x28   : > { %565 = dma.hbm_to_vmem [thread:$0]  (!%p851_p12), %s228_s17, 128, %s230_s19, %s218_s26  }
  0x29   : > { %p875_p1 = pnand %p551_p13, %p253_p0  ;;  %s244_s28 = scalar_lea.hbm %s1055_s1, %s548_s12 }
  0x2a   : > { %s246_s29 = sshll.u32 %s244_s28, 4  ;;  %s240_s15 = scalar_lea.vmem [#allocation5], %s547_s13  ;;  %s247_s29 = int_to_ptr.hbm [resolvable:$true] %s246_s29 }
  0x2b   : > { %s248_s18 = sshll.u32 %s240_s15, 4  ;;  %s237_s0 = scalar_lea.sflag [#allocation6], %s842_s11  ;;  %s249_s18 = int_to_ptr.vmem [resolvable:$true] %s248_s18 }
  0x2c   : > { %s646_s30 = sshra.s32 %s247_s29, 4  ;;  %s653_s26 = scalar_lea.hbm %s1055_s1, 32  ;;  %s647_s30 = int_to_ptr.hbm [resolvable:$true] %s646_s30 }
  0x2d   : > { %s648_s23 = scalar_lea.hbm %s647_s30, 8  ;;  %p654_p4 = scmp.lt.s32.totalorder %s647_s30, %s1055_s1 }
  0x2e   : > { %p649_p3 = scmp.ne.s32.totalorder %s647_s30, %s648_s23  ;;  %p655_p5 = scmp.lt.s32.totalorder %s653_s26, %s648_s23 }
  0x30   : > { %p651_p13 = pnand %p649_p3, %p620_p2  ;;  %p656_p7 = por %p655_p5, %p654_p4 }
  0x32   : > { %p652_p0 = pneg %p651_p13 }
  0x34   : > { %p657_p8 = pnand %p656_p7, %p652_p0 }
  0x36   : > { %660 = shalt.err (!%p657_p8)
}
  0x37   : > { %568 = dma.hbm_to_vmem [thread:$0]  (!%p851_p12), %s247_s29, 128, %s249_s18, %s237_s0  }
  0x38   : > { %257 = sbr.rel (%p875_p1) target bundleno = 546 (0x222), region = 44  ;;  %s897_s11 = sand.u32 (!%p875_p1), 1, %s738_s22  }
  0x39   : > { %s552_s13 = sshll.u32 (!%p875_p1), %s897_s11, 3  ;;  %s260_s16 = scalar_lea.sflag (!%p875_p1), [#allocation3], %s897_s11 }
  0x3a   : > { %s901_s28 = scalar_lea.vmem (!%p875_p1), [#allocation2], %s552_s13 }
  0x3d   : > { %721 = dma.done.wait (%p827_p6), %s260_s16, 128  }
  0x3e   : > { %723 = vsyncadd (%p827_p6), %s260_s16, 4294967168  ;;  %s270_s0 = scalar_lea.sflag [#allocation6], %s897_s11  ;;  %s908_s23 = scalar_lea.vmem [#allocation5], %s552_s13 }
  0x3f   : > { %725 = dma.done.wait (%p827_p6), %s270_s0, 128  }
  0x40   : > { %727 = vsyncadd (%p827_p6), %s270_s0, 4294967168  ;;  %v322_v0 = vld [vmem:[%s1056_s2 + $0x78] sm:$0xff]  ;;  %v321_v1 = vld [vmem:[%s1056_s2 + $0x70] sm:$0xff]  ;;  %vm389_vm0 = vcmask 31744   ;;  %s451_s26 = scalar_lea.hbm %s1060_s6, %s805_s25  ;;  %s306_s14 = scalar_lea.vmem [#allocation7], %s897_s11 }
  0x41   : > { %345 = vmatpush.msra.mxu0 %v322_v0  ;;  %v320_v2 = vld [vmem:[%s1056_s2 + $0x68] sm:$0xff]  ;;  %v319_v3 = vld [vmem:[%s1056_s2 + $0x60] sm:$0xff]  ;;  %v338_v4 = vld [vmem:[%s1058_s4 + $0x78] sm:$0xff]  ;;  %s453_s12 = sshll.u32 %s306_s14, 4  ;;  %s455_s13 = sshll.u32 %s451_s26, 4  ;;  %s454_s12 = int_to_ptr.vmem [resolvable:$true] %s453_s12  ;;  %s456_s13 = int_to_ptr.hbm [resolvable:$true] %s455_s13 }
  0x42   : > { %v318_v5 = vld [vmem:[%s1056_s2 + $0x58] sm:$0xff]  ;;  %369 = vmatpush.msra.mxu1 %v338_v4  ;;  %v337_v6 = vld [vmem:[%s1058_s4 + $0x70] sm:$0xff]  ;;  %v336_v7 = vld [vmem:[%s1058_s4 + $0x68] sm:$0xff]  ;;  %s690_s16 = sshra.s32 %s456_s13, 4  ;;  %s696_s25 = scalar_lea.hbm %s1060_s6, 4  ;;  %s691_s16 = int_to_ptr.hbm [resolvable:$true] %s690_s16 }
  0x43   : > { %346 = vmatpush.msra.mxu0 %v321_v1  ;;  %v317_v8 = vld [vmem:[%s1056_s2 + $0x50] sm:$0xff]  ;;  %v335_v9 = vld [vmem:[%s1058_s4 + $0x60] sm:$0xff]  ;;  %v316_v10 = vld [vmem:[%s1056_s2 + $0x48] sm:$0xff]  ;;  %s692_s0 = scalar_lea.hbm %s691_s16, 1  ;;  %p697_p9 = scmp.lt.s32.totalorder %s691_s16, %s1060_s6 }
  0x44   : > { %370 = vmatpush.msra.mxu1 %v337_v6  ;;  %v334_v11 = vld [vmem:[%s1058_s4 + $0x58] sm:$0xff]  ;;  %v315_v12 = vld [vmem:[%s1056_s2 + $0x40] sm:$0xff]  ;;  %v333_v13 = vld [vmem:[%s1058_s4 + $0x50] sm:$0xff]  ;;  %p693_p6 = scmp.ne.s32.totalorder %s691_s16, %s692_s0  ;;  %p698_p1 = scmp.lt.s32.totalorder %s696_s25, %s692_s0 }
  0x45   : > { %347 = vmatpush.msra.mxu0 %v320_v2  ;;  %v314_v14 = vld [vmem:[%s1056_s2 + $0x38] sm:$0xff]  ;;  %v332_v15 = vld [vmem:[%s1058_s4 + $0x48] sm:$0xff]  ;;  %v313_v16 = vld [vmem:[%s1056_s2 + $0x30] sm:$0xff] }
  0x46   : > { %371 = vmatpush.msra.mxu1 %v336_v7  ;;  %v331_v17 = vld [vmem:[%s1058_s4 + $0x40] sm:$0xff]  ;;  %v312_v18 = vld [vmem:[%s1056_s2 + $0x28] sm:$0xff]  ;;  %v330_v19 = vld [vmem:[%s1058_s4 + $0x38] sm:$0xff]  ;;  %p694_p12 = pnand %p693_p6, %p833_p10  ;;  %p699_p3 = por %p698_p1, %p697_p9 }
  0x47   : > { %348 = vmatpush.msra.mxu0 %v319_v3  ;;  %v311_v20 = vld [vmem:[%s1056_s2 + $0x20] sm:$0xff]  ;;  %v329_v21 = vld [vmem:[%s1058_s4 + $0x30] sm:$0xff]  ;;  %v310_v22 = vld [vmem:[%s1056_s2 + $0x18] sm:$0xff] }
  0x48   : > { %372 = vmatpush.msra.mxu1 %v335_v9  ;;  %v328_v23 = vld [vmem:[%s1058_s4 + $0x28] sm:$0xff]  ;;  %v309_v24 = vld [vmem:[%s1056_s2 + $0x10] sm:$0xff]  ;;  %v327_v25 = vld [vmem:[%s1058_s4 + $0x20] sm:$0xff]  ;;  %p695_p2 = pneg %p694_p12 }
  0x49   : > { %349 = vmatpush.msra.mxu0 %v318_v5  ;;  %v308_v26 = vld [vmem:[%s1056_s2 + $0x8] sm:$0xff]  ;;  %v326_v27 = vld [vmem:[%s1058_s4 + $0x18] sm:$0xff]  ;;  %v307_v28 = vld [vmem:[%s1056_s2] sm:$0xff]  ;;  %v748_v5 = vmov 4.0  }
  0x4a   : > { %373 = vmatpush.msra.mxu1 %v334_v11  ;;  %v341_v29 = vld [vmem:[%s901_s28] sm:$0xff]  ;;  %v325_v30 = vld [vmem:[%s1058_s4 + $0x10] sm:$0xff]  ;;  %p700_p13 = pnand %p699_p3, %p695_p2 }
  0x4b   : > { %350 = vmatpush.msra.mxu0 %v317_v8  ;;  %v324_v31 = vld [vmem:[%s1058_s4 + $0x8] sm:$0xff]  ;;  %v323_v32 = vld [vmem:[%s1058_s4] sm:$0xff] }
  0x4c   : > { %374 = vmatpush.msra.mxu1 %v333_v13  ;;  %v608_v33 = vld [vmem:[%s1057_s3] ss:$0 sm:$0xff]  ;;  %v433_v13 = vld [vmem:[%s908_s23] sm:$0xff]  ;;  %s443_s23 = scalar_lea.sflag [#allocation4], %s897_s11 }
  0x4d   : > { %351 = vmatpush.msra.mxu0 %v316_v10  ;;  %v609_v37 = vld [vmem:[%s1059_s5] ss:$0 sm:$0xff] }
  0x4e   : > { %375 = vmatpush.msra.mxu1 %v332_v15 }
  0x4f   : > { %352 = vmatpush.msra.mxu0 %v315_v12 }
  0x50   : > { %376 = vmatpush.msra.mxu1 %v331_v17 }
  0x51   : > { %353 = vmatpush.msra.mxu0 %v314_v14 }
  0x52   : > { %377 = vmatpush.msra.mxu1 %v330_v19 }
  0x53   : > { %354 = vmatpush.msra.mxu0 %v313_v16 }
  0x54   : > { %378 = vmatpush.msra.mxu1 %v329_v21 }
  0x55   : > { %355 = vmatpush.msra.mxu0 %v312_v18 }
  0x56   : > { %379 = vmatpush.msra.mxu1 %v328_v23 }
  0x57   : > { %356 = vmatpush.msra.mxu0 %v311_v20 }
  0x58   : > { %380 = vmatpush.msra.mxu1 %v327_v25 }
  0x59   : > { %357 = vmatpush.msra.mxu0 %v310_v22 }
  0x5a   : > { %381 = vmatpush.msra.mxu1 %v326_v27 }
  0x5b   : > { %358 = vmatpush.msra.mxu0 %v309_v24 }
  0x5c   : > { %382 = vmatpush.msra.mxu1 %v325_v30 }
  0x5d   : > { %359 = vmatpush.msra.mxu0 %v308_v26 }
  0x5e   : > { %383 = vmatpush.msra.mxu1 %v324_v31 }
  0x5f   : > { %360 = vmatpush.msra.mxu0 %v307_v28 }
  0x60   : > { %361 = vmatmul.f32.vlgmr.msra.gmra.mxu0 %v341_v29  ;;  %384 = vmatpush.msra.mxu1 %v323_v32 }
  0xdd   : > { %v362_v34 = vpop.f32.mrf.mxu0 }
  0xde   : > { %v363_v35 = vadd.f32 %v608_v33, %v362_v34 }
  0xe0   : > { %v365_v36 = vmax.f32 %v363_v35, 0.0 }
  0xe2   : > { %385 = vmatmul.f32.vlgmr.msra.gmra.mxu1 %v365_v36 }
 0x15f   : > { %v386_v38 = vpop.f32.mrf.mxu1 }
 0x160   : > { %v387_v39 = vadd.f32 %v609_v37, %v386_v38 }
 0x162   : > { %v390_v40 = vsel %vm389_vm0, %v387_v39, -inf }
 0x163   : > { %v391_v41 = vrot.slane %v390_v40, 4 }
 0x165   : > { %v392_v42 = vmax.f32 %v390_v40, %v391_v41 }
 0x167   : > { %v393_v43 = vrot.slane %v392_v42, 2 }
 0x169   : > { %v394_v44 = vmax.f32 %v392_v42, %v393_v43 }
 0x16b   : > { %v395_v45 = vrot.slane %v394_v44, 1 }
 0x16d   : > { %v396_v46 = vmax.f32 %v394_v44, %v395_v45 }
 0x16f   : > { %v397_v47 = vsub.f32 %v387_v39, %v396_v46 }
 0x171   : > { %v398_v48 = vmul.f32 1.442695, %v397_v47 }
 0x173   : > { %610 = vpow2.f32 %v398_v48 }
 0x179   : > { %v611_v49 = vpop.eup %610 }
 0x17a   : > { %v400_v50 = vsel %vm389_vm0, %v611_v49, 0.0 }
 0x17b   : > { %v401_v51 = vrot.slane %v400_v50, 4 }
 0x17d   : > { %v402_v52 = vadd.f32 %v401_v51, %v400_v50 }
 0x17f   : > { %v403_v53 = vrot.slane %v402_v52, 2 }
 0x181   : > { %v404_v54 = vadd.f32 %v403_v53, %v402_v52 }
 0x183   : > { %v405_v55 = vrot.slane %v404_v54, 1 }
 0x185   : > { %v406_v56 = vadd.f32 %v405_v55, %v404_v54 }
 0x187   : > { %612 = vrcp.f32 %v406_v56  ;;  %v418_v60 = vand.u32 2147483648, %v406_v56  ;;  %v416_v62 = vand.u32 2147483647, %v406_v56  ;;  %vm412_vm2 = vweird.f32 %v406_v56 }
 0x188   : > { %614 = vrcp.f32 %v748_v5 }
 0x189   : > { %v419_v0 = vor.u32 1.1754944e-38, %v418_v60  ;;  %vm417_vm4 = vcmp.eq.f32.partialorder %v416_v62, 8.507059e+37 }
 0x18d   : > { %v613_v57 = vpop.eup %612 }
 0x18e   : > { %v408_v58 = vmul.f32 %v613_v57, %v406_v56  ;;  %vm413_vm1 = vweird.f32 %v613_v57  ;;  %v615_v6 = vpop.eup %614 }
 0x18f   : > { %vm414_vm3 = vmor %vm412_vm2, %vm413_vm1  ;;  %v426_v7 = vmul.f32 4.0, %v615_v6  ;;  %vm430_vm5 = vweird.f32 %v615_v6 }
 0x190   : > { %v409_v59 = vsub.f32 1.0, %v408_v58 }
 0x191   : > { %v427_v8 = vsub.f32 1.0, %v426_v7 }
 0x192   : > { %v410_v61 = vmul.f32 %v613_v57, %v409_v59 }
 0x193   : > { %v428_v9 = vmul.f32 %v615_v6, %v427_v8 }
 0x194   : > { %v411_v63 = vadd.f32 %v613_v57, %v410_v61 }
 0x195   : > { %v429_v10 = vadd.f32 %v615_v6, %v428_v9 }
 0x196   : > { %v415_v1 = vsel %vm414_vm3, %v613_v57, %v411_v63 }
 0x197   : > { %v420_v2 = vsel %vm417_vm4, %v419_v0, %v415_v1  ;;  %v431_v11 = vsel %vm430_vm5, %v615_v6, %v429_v10 }
 0x198   : > { %v421_v3 = vmul.f32 %v611_v49, %v420_v2 }
 0x19a   : > { %v422_v4 = vsel %vm389_vm0, %v421_v3, 0.0 }
 0x19b   : > { %423 = vadd.xlane.f32.xlu0 %v422_v4 }
 0x20e   : > { %v424_v12 = vpop.xlane.xlu0 %423 }
 0x20f   : > { %v432_v14 = vmul.f32 %v431_v11, %v424_v12 }
 0x211   : > { %v434_v15 = vmul.f32 %v433_v13, %v432_v14 }
 0x213   : > { %v435_v16 = vrot.slane %v434_v15, 4 }
 0x215   : > { %v436_v17 = vadd.f32 %v435_v16, %v434_v15 }
 0x217   : > { %v437_v18 = vrot.slane %v436_v17, 2 }
 0x219   : > { %v438_v19 = vadd.f32 %v437_v18, %v436_v17 }
 0x21b   : > { %v439_v20 = vrot.slane %v438_v19, 1 }
 0x21d   : > { %v440_v21 = vadd.f32 %v439_v20, %v438_v19 }
 0x21f   : > { %441 = vst [vmem:[%s306_s14] sm:$0x1] %v440_v21 }
 0x220   : > { %703 = shalt.err (!%p700_p13)
}
 0x221   : > { %560 = dma.vmem_to_hbm [thread:$0]  (%p833_p10), %s454_s12, 16, %s456_s13, %s443_s23  }
 0x222 PF: > { %p574_p0 = scmp.ge.s32.totalorder %s746_s24, 2  ;;  %s467_s11 = sand.u32 1, %s734_s21  }
 0x223   : > { %s468_s15 = scalar_lea.sflag [#allocation4], %s467_s11 }
 0x224   : > { %p570_p4 = pnand %p574_p0, %p837_p11 }
 0x226   : > { %p571_p5 = pneg %p570_p4 }
 0x228   : > { %729 = dma.done.wait (%p571_p5), %s468_s15, 16  }
 0x229   : > { %731 = vsyncadd (%p571_p5), %s468_s15, 4294967280  ;;  %s1072_s28 = sld [smem:[#allocation11_spill]]  ;;  %p22_p7 = scmp.ge.s32.totalorder %s809_s27, 6  }
 0x22a   : > { %s1073_s23 = sld [smem:[#allocation12_spill]]  ;;  %s1074_s21 = smov %s738_s22 }
 0x22b   : > { %s1076_s24 = smov %s809_s27  ;;  %24 = sbr.rel (!%p22_p7) target bundleno = 9 (0x9), region = 102 }
 0x22f   : > { %s1075_s22 = smov %s1072_s28 }
 0x230   :  { %473 = vsyncpa [#allocation3], 1 }
 0x231   :  { %475 = vsyncpa [#allocation3 + $0x1], 1 }
 0x232   :  { %476 = vsyncpa [#allocation6], 1 }
 0x233   :  { %478 = vsyncpa [#allocation6 + $0x1], 1 }
 0x234   :  { %479 = vsyncpa [#allocation4], 1 }
 0x235   :  { %481 = vsyncpa [#allocation4 + $0x1], 1 }

</bundles_post_ra>
